<compile_context>
chip_gen: v7x
topology: tpu7x:2x2x1
jax: 0.10.0
libtpu: 0.0.40
codegen_flags: <defaults>
</compile_context>

<pallas_src>
import functools

import jax
import jax.numpy as jnp
from jax.experimental import pallas as pl
from jax.experimental.pallas import tpu as pltpu


def _exp_loss_kernel(beta_ref, inp_ref, tgt_ref, pk_ref, out_ref, acc_ref, *,
                     rows_valid, rows_per_block, k_steps, need_mask):
    # Grid = (parallel row-block groups P, reduction steps K within a group).
    p = pl.program_id(0)
    k = pl.program_id(1)

    @pl.when(k == 0)
    def _():
        acc_ref[...] = jnp.zeros_like(acc_ref)

    beta = beta_ref[0, 0]
    x = inp_ref[...].astype(jnp.float32)
    t = tgt_ref[...].astype(jnp.float32)
    e = pk_ref[...].astype(jnp.float32)
    # |a*s - b*s| == |(a-b)*s| : single multiply, handles any sign of s.
    contrib = jnp.abs((x - t) * (1.0 + beta * e))

    if need_mask:
        # Mask rows that fall beyond the real data: covers the ragged last
        # row-block and any duplicated (index-clamped) blocks when
        # P*K > number of row blocks.  Pure VPU work, hidden under DMA.
        blk = p * k_steps + k
        row_ids = blk * rows_per_block + jax.lax.broadcasted_iota(
            jnp.int32, contrib.shape, 0)
        contrib = jnp.where(row_ids < rows_valid, contrib, 0.0)

    acc_ref[...] += contrib

    @pl.when(k == pl.num_programs(1) - 1)
    def _():
        # Per-parallel-group partial sum, broadcast over one (8,128)-aligned
        # tile (keeps the output block layout legal); wrapper reads [p, 0, 0].
        s = jnp.sum(acc_ref[...])
        out_ref[...] = jnp.broadcast_to(s, out_ref.shape)


def _round_up(x, m):
    return ((x + m - 1) // m) * m


def _default_num_parallel():
    # Two TensorCores share the grid only on v7x-class chips; on 1-TC chips a
    # "parallel" axis is just a serial loop with extra reduce/store overhead.
    try:
        kind = jax.devices()[0].device_kind.lower()
    except Exception:
        return 1
    return 2 if ("v7" in kind or "tpu7" in kind or "7x" in kind) else 1


def exp_loss_pallas(inp, tgt, peaks, beta, *,
                    max_lane=1024, max_rows_per_block=512, num_parallel=None):
    """L1Loss(input*(1+beta*peaks), target*(1+beta*peaks)), mean reduction."""
    assert inp.shape == tgt.shape == peaks.shape
    n = int(inp.size)
    if n == 0:
        return jnp.float32(0.0)

    beta_arr = jnp.asarray(beta, jnp.float32).reshape(1, 1)
    inp_f = jnp.ravel(inp)
    tgt_f = jnp.ravel(tgt)
    pk_f = jnp.ravel(peaks)

    # Lane-dense layout: lane is a multiple of 128, sized so ~8 rows cover n
    # for small inputs (minimal waste), capped at max_lane for big inputs.
    max_lane = max(128, (max_lane // 128) * 128)
    lane = min(max(128, _round_up(-(-n // 8), 128)), max_lane)

    rows_bulk = n // lane          # full rows handled by the Pallas kernel
    bulk = rows_bulk * lane
    tail = n - bulk                # < lane leftover elements -> plain jnp

    tail_sum = jnp.float32(0.0)
    if tail:
        xt = inp_f[bulk:].astype(jnp.float32)
        tt = tgt_f[bulk:].astype(jnp.float32)
        et = pk_f[bulk:].astype(jnp.float32)
        tail_sum = jnp.sum(jnp.abs((xt - tt) * (1.0 + beta_arr[0, 0] * et)))

    if rows_bulk == 0:             # tiny input (< one lane): no kernel needed
        return tail_sum / jnp.float32(n)

    def as2d(a):
        a = a[:bulk] if tail else a          # pure reshape when tail == 0
        return a.reshape(rows_bulk, lane)

    inp2, tgt2, pk2 = as2d(inp_f), as2d(tgt_f), as2d(pk_f)

    # Row blocking: rpb is either the full row count (always a legal block) or
    # a multiple of 16/8 (sub-32-bit / 32-bit dtypes).
    sub = 16 if min(inp2.dtype.itemsize, tgt2.dtype.itemsize,
                    pk2.dtype.itemsize) < 4 else 8
    if rows_bulk <= max_rows_per_block:
        rpb = rows_bulk
    else:
        rpb = max(sub, (max_rows_per_block // sub) * sub)
    nrb = -(-rows_bulk // rpb)

    if num_parallel is None:
        num_parallel = _default_num_parallel()
    P = max(1, min(int(num_parallel), nrb))
    K = -(-nrb // P)
    need_mask = (rows_bulk != nrb * rpb) or (P * K != nrb)

    def sig_index_map(p, k):
        blk = p * K + k
        if P * K != nrb:          # keep DMA in-bounds; in-kernel mask zeroes dups
            blk = jnp.minimum(blk, nrb - 1)
        return (blk, 0)

    sig_spec = pl.BlockSpec((rpb, lane), sig_index_map)
    out_spec = pl.BlockSpec((1, 8, 128), lambda p, k: (p, 0, 0))

    kernel = functools.partial(
        _exp_loss_kernel, rows_valid=rows_bulk, rows_per_block=rpb,
        k_steps=K, need_mask=need_mask)

    in_bytes = sum(int(a.size) * a.dtype.itemsize for a in (inp2, tgt2, pk2))
    cost = pl.CostEstimate(flops=6 * bulk, transcendentals=0,
                           bytes_accessed=in_bytes + P * 8 * 128 * 4)

    partials = pl.pallas_call(
        kernel,
        out_shape=jax.ShapeDtypeStruct((P, 8, 128), jnp.float32),
        grid=(P, K),
        in_specs=[pl.BlockSpec(memory_space=pltpu.MemorySpace.SMEM),
                  sig_spec, sig_spec, sig_spec],
        out_specs=out_spec,
        scratch_shapes=[pltpu.VMEM((rpb, lane), jnp.float32)],
        compiler_params=pltpu.CompilerParams(
            dimension_semantics=("parallel", "arbitrary"),
            vmem_limit_bytes=32 * 1024 * 1024),
        cost_estimate=cost,
    )(beta_arr, inp2, tgt2, pk2)

    return (jnp.sum(partials[:, 0, 0]) + tail_sum) / jnp.float32(n)


def exp_loss_ref(inp, tgt, peaks, beta):
    s = 1.0 + beta * peaks
    return jnp.mean(jnp.abs(inp * s - tgt * s))


if __name__ == "__main__":
    key = jax.random.PRNGKey(0)
    k1, k2, k3 = jax.random.split(key, 3)

    # rPPG-style signals: batch of 4, sequence length 256; beta hyper-param.
    B, T = 4, 256
    beta = 0.5

    inp = jax.random.normal(k1, (B, T), dtype=jnp.float32)
    tgt = jax.random.normal(k2, (B, T), dtype=jnp.float32)
    exp_peaks = jax.random.uniform(k3, (B, T), dtype=jnp.float32)

    out = jax.block_until_ready(exp_loss_pallas(inp, tgt, exp_peaks, beta))
    ref = exp_loss_ref(inp, tgt, exp_peaks, beta)
    assert jnp.allclose(out, ref, rtol=1e-5, atol=1e-6), (out, ref)

    # Ragged size + forced 2-way parallel grid + multi-block reduction:
    # exercises the in-kernel row mask, the clamped duplicate block and the
    # jnp tail path (the same code paths a v7x run would take).
    i2 = jax.random.normal(k1, (3, 1000), dtype=jnp.float32)
    t2 = jax.random.normal(k2, (3, 1000), dtype=jnp.float32)
    p2 = jax.random.uniform(k3, (3, 1000), dtype=jnp.float32)
    out2 = jax.block_until_ready(
        exp_loss_pallas(i2, t2, p2, beta, max_lane=128,
                        max_rows_per_block=8, num_parallel=2))
    ref2 = exp_loss_ref(i2, t2, p2, beta)
    assert jnp.allclose(out2, ref2, rtol=1e-5, atol=1e-6), (out2, ref2)

    # bf16 inputs stay bf16 on the HBM wire (cast to f32 in-vreg).
    i3 = jax.random.normal(k1, (16, 1024), dtype=jnp.bfloat16)
    t3 = jax.random.normal(k2, (16, 1024), dtype=jnp.bfloat16)
    p3 = jax.random.uniform(k3, (16, 1024), dtype=jnp.bfloat16)
    out3 = jax.block_until_ready(exp_loss_pallas(i3, t3, p3, beta))
    ref3 = exp_loss_ref(i3.astype(jnp.float32), t3.astype(jnp.float32),
                        p3.astype(jnp.float32), beta)
    assert jnp.allclose(out3, ref3, rtol=1e-4, atol=1e-5), (out3, ref3)

    print("KERNEL_OK")
</pallas_src>

<mosaic_0001>
module attributes {stable_mosaic.version = 11 : i64} {
  func.func @_exp_loss_kernel(%arg0: i32, %arg1: i32, %arg2: memref<1x1xf32, #tpu.memory_space<smem>>, %arg3: memref<8x128xf32, #tpu.memory_space<vmem>>, %arg4: memref<8x128xf32, #tpu.memory_space<vmem>>, %arg5: memref<8x128xf32, #tpu.memory_space<vmem>>, %arg6: memref<1x8x128xf32, #tpu.memory_space<vmem>>, %arg7: memref<8x128xf32, #tpu.memory_space<vmem>>) attributes {dimension_semantics = [#tpu.dimension_semantics<parallel>, #tpu.dimension_semantics<arbitrary>], iteration_bounds = array<i64: 1, 1>, scalar_prefetch = 0 : i64, scratch_operands = 1 : i64, tpu.core_type = #tpu.core_type<tc>, window_params = [{transform_indices = @transform_0, window_bounds = array<i64: 1, 1>}, {transform_indices = @transform_1, window_bounds = array<i64: 8, 128>}, {transform_indices = @transform_2, window_bounds = array<i64: 8, 128>}, {transform_indices = @transform_3, window_bounds = array<i64: 8, 128>}, {transform_indices = @transform_4, window_bounds = array<i64: 1, 8, 128>}]} {
    %c0_i32 = arith.constant 0 : i32
    %0 = arith.cmpi eq, %arg1, %c0_i32 : i32
    %1 = arith.extui %0 : i1 to i32
    %c0_i32_0 = arith.constant 0 : i32
    %2 = arith.cmpi ne, %1, %c0_i32_0 : i32
    scf.if %2 {
      %cst_14 = arith.constant 0.000000e+00 : f32
      %20 = vector.broadcast %cst_14 : f32 to vector<8x128xf32>
      %c0_15 = arith.constant 0 : index
      %c0_16 = arith.constant 0 : index
      %21 = vector.load %arg7[%c0_15, %c0_16] : memref<8x128xf32, #tpu.memory_space<vmem>>, vector<8x128xf32>
      tpu.vector_store %arg7[%c0_15, %c0_16], %20 {strides = array<i32>} : memref<8x128xf32, #tpu.memory_space<vmem>>, vector<8x128xf32>,
    } else {
    }
    %c0 = arith.constant 0 : index
    %c0_1 = arith.constant 0 : index
    %3 = memref.load %arg2[%c0, %c0_1] : memref<1x1xf32, #tpu.memory_space<smem>>
    %c0_2 = arith.constant 0 : index
    %c0_3 = arith.constant 0 : index
    %4 = vector.load %arg3[%c0_2, %c0_3] : memref<8x128xf32, #tpu.memory_space<vmem>>, vector<8x128xf32>
    %c0_4 = arith.constant 0 : index
    %c0_5 = arith.constant 0 : index
    %5 = vector.load %arg4[%c0_4, %c0_5] : memref<8x128xf32, #tpu.memory_space<vmem>>, vector<8x128xf32>
    %c0_6 = arith.constant 0 : index
    %c0_7 = arith.constant 0 : index
    %6 = vector.load %arg5[%c0_6, %c0_7] : memref<8x128xf32, #tpu.memory_space<vmem>>, vector<8x128xf32>
    %7 = arith.subf %4, %5 : vector<8x128xf32>
    %8 = vector.broadcast %3 : f32 to vector<8x128xf32>
    %9 = arith.mulf %8, %6 : vector<8x128xf32>
    %cst = arith.constant 1.000000e+00 : f32
    %10 = vector.broadcast %cst : f32 to vector<8x128xf32>
    %11 = arith.addf %10, %9 : vector<8x128xf32>
    %12 = arith.mulf %7, %11 : vector<8x128xf32>
    %13 = math.absf %12 : vector<8x128xf32>
    %c0_8 = arith.constant 0 : index
    %c0_9 = arith.constant 0 : index
    %14 = vector.load %arg7[%c0_8, %c0_9] : memref<8x128xf32, #tpu.memory_space<vmem>>, vector<8x128xf32>
    %15 = arith.addf %14, %13 : vector<8x128xf32>
    %c0_10 = arith.constant 0 : index
    %c0_11 = arith.constant 0 : index
    %16 = vector.load %arg7[%c0_10, %c0_11] : memref<8x128xf32, #tpu.memory_space<vmem>>, vector<8x128xf32>
    tpu.vector_store %arg7[%c0_10, %c0_11], %15 {strides = array<i32>} : memref<8x128xf32, #tpu.memory_space<vmem>>, vector<8x128xf32>,
    %c0_i32_12 = arith.constant 0 : i32
    %17 = arith.cmpi eq, %arg1, %c0_i32_12 : i32
    %18 = arith.extui %17 : i1 to i32
    %c0_i32_13 = arith.constant 0 : i32
    %19 = arith.cmpi ne, %18, %c0_i32_13 : i32
    scf.if %19 {
      %c0_14 = arith.constant 0 : index
      %c0_15 = arith.constant 0 : index
      %20 = vector.load %arg7[%c0_14, %c0_15] : memref<8x128xf32, #tpu.memory_space<vmem>>, vector<8x128xf32>
      %21 = vector.shape_cast %20 : vector<8x128xf32> to vector<1x8x128xf32>
      %cst_16 = arith.constant dense<0.000000e+00> : vector<1xf32>
      %22 = vector.multi_reduction <add>, %21, %cst_16 [1, 2] : vector<1x8x128xf32> to vector<1xf32>
      %23 = vector.shape_cast %22 : vector<1xf32> to vector<1x1x1xf32>
      %24 = vector.extract %23[0, 0, 0] : f32 from vector<1x1x1xf32>
      %25 = vector.broadcast %24 : f32 to vector<1x8x128xf32>
      %c0_17 = arith.constant 0 : index
      %c0_18 = arith.constant 0 : index
      %c0_19 = arith.constant 0 : index
      %26 = vector.load %arg6[%c0_17, %c0_18, %c0_19] : memref<1x8x128xf32, #tpu.memory_space<vmem>>, vector<1x8x128xf32>
      tpu.vector_store %arg6[%c0_17, %c0_18, %c0_19], %25 {strides = array<i32>} : memref<1x8x128xf32, #tpu.memory_space<vmem>>, vector<1x8x128xf32>,
    } else {
    }
    return
  }
  func.func @transform_0(%arg0: i32, %arg1: i32) -> (i32, i32) {
    %c0_i32 = arith.constant 0 : i32
    %c0_i32_0 = arith.constant 0 : i32
    %c0_i32_1 = arith.constant 0 : i32
    return %c0_i32, %c0_i32_0 : i32, i32
  }
  func.func @transform_1(%arg0: i32, %arg1: i32) -> (i32, i32) {
    %c1_i32 = arith.constant 1 : i32
    %0 = arith.muli %arg0, %c1_i32 : i32
    %1 = arith.addi %0, %arg1 : i32
    %c0_i32 = arith.constant 0 : i32
    %c0_i32_0 = arith.constant 0 : i32
    return %1, %c0_i32 : i32, i32
  }
  func.func @transform_2(%arg0: i32, %arg1: i32) -> (i32, i32) {
    %c1_i32 = arith.constant 1 : i32
    %0 = arith.muli %arg0, %c1_i32 : i32
    %1 = arith.addi %0, %arg1 : i32
    %c0_i32 = arith.constant 0 : i32
    %c0_i32_0 = arith.constant 0 : i32
    return %1, %c0_i32 : i32, i32
  }
  func.func @transform_3(%arg0: i32, %arg1: i32) -> (i32, i32) {
    %c1_i32 = arith.constant 1 : i32
    %0 = arith.muli %arg0, %c1_i32 : i32
    %1 = arith.addi %0, %arg1 : i32
    %c0_i32 = arith.constant 0 : i32
    %c0_i32_0 = arith.constant 0 : i32
    return %1, %c0_i32 : i32, i32
  }
  func.func @transform_4(%arg0: i32, %arg1: i32) -> (i32, i32, i32) {
    %c0_i32 = arith.constant 0 : i32
    %c0_i32_0 = arith.constant 0 : i32
    %c0_i32_1 = arith.constant 0 : i32
    return %arg0, %c0_i32, %c0_i32_0 : i32, i32, i32
  }
}

</mosaic_0001>

<bundles_post_ra>
// kernel: tpu_custom_call.1
= control target key start
LH: loop header
LB: loop body
LE: loop exit
PB: predicated region body
PF: predicated region fallthrough
CT: control target
= control target key end

     0   :  { %10 = vsyncpa [#allocation5], 0  ;;  %s270_s0 = inlined_call_operand.<no memory space> [shape: f32[1,1], index: 0, kind: input, shape index: {}]   ;;  %s271_s1 = inlined_call_operand.hbm [shape: f32[8,128], index: 1, kind: input, shape index: {}]   ;;  %s272_s2 = inlined_call_operand.hbm [shape: f32[8,128], index: 2, kind: input, shape index: {}]   ;;  %s273_s3 = inlined_call_operand.vmem [shape: f32[8,128], index: 3, kind: input, shape index: {}]   ;;  %s274_s4 = inlined_call_operand.hbm [shape: f32[1,8,128], index: 4, kind: output, shape index: {}]  }
   0x1   :  { %11 = vsyncpa [#allocation8], 0 }
   0x2   :  { %12 = vsyncpa [#allocation6], 0  ;;  %s200_s15 = smov [#allocation4]   ;;  %s201_s17 = smov [#allocation7]  }
   0x3   :  { %s24_s16 = sshll.u32 %s200_s15, 4  ;;  %s37_s18 = sshll.u32 %s201_s17, 4  ;;  %s25_s16 = int_to_ptr.vmem [resolvable:$true] %s24_s16  ;;  %s38_s18 = int_to_ptr.vmem [resolvable:$true] %s37_s18 }
   0x4   :  { %s128_s21 = scalar_lea.hbm %s271_s1, 128 }
   0x5   :  { %p129_p0 = scmp.ne.s32.totalorder %s271_s1, %s128_s21  ;;  %p132_p1 = scmp.lt.u32.totalorder %s128_s21, %s271_s1 }
   0x7   :  { %p134_p2 = pnand %p132_p1, %p129_p0 }
   0x9   :  { %137 = shalt.err (!%p134_p2)
}
   0xa   :  { %s138_s26 = scalar_lea.vmem %s25_s16, 128  ;;  %p143_p4 = scmp.lt.s32.totalorder %s25_s16, %s25_s16 }
   0xb   :  { %p139_p3 = scmp.ne.s32.totalorder %s25_s16, %s138_s26  ;;  %p144_p5 = scmp.lt.s32.totalorder %s138_s26, %s138_s26 }
   0xd   :  { %p145_p6 = por %p144_p5, %p143_p4 }
   0xf   :  { %p146_p7 = pnand %p145_p6, %p139_p3 }
  0x11   :  { %149 = shalt.err (!%p146_p7)
}
  0x12   :  { %27 = dma.hbm_to_vmem [thread:$0]  %s271_s1, 128, %s25_s16, [#allocation5]  }
  0x13   :  { %s150_s5 = scalar_lea.hbm %s272_s2, 128 }
  0x14   :  { %p151_p8 = scmp.ne.s32.totalorder %s272_s2, %s150_s5  ;;  %p154_p9 = scmp.lt.u32.totalorder %s150_s5, %s272_s2 }
  0x16   :  { %p156_p10 = pnand %p154_p9, %p151_p8 }
  0x18   :  { %159 = shalt.err (!%p156_p10)
}
  0x19   :  { %s160_s10 = scalar_lea.vmem %s38_s18, 128  ;;  %p165_p12 = scmp.lt.s32.totalorder %s38_s18, %s38_s18 }
  0x1a   :  { %p161_p11 = scmp.ne.s32.totalorder %s38_s18, %s160_s10  ;;  %p166_p13 = scmp.lt.s32.totalorder %s160_s10, %s160_s10 }
  0x1c   :  { %p167_p0 = por %p166_p13, %p165_p12 }
  0x1e   :  { %p168_p1 = pnand %p167_p0, %p161_p11 }
  0x20   :  { %171 = shalt.err (!%p168_p1)
}
  0x21   :  { %40 = dma.hbm_to_vmem [thread:$0]  %s272_s2, 128, %s38_s18, [#allocation8]  }
  0x22   :  { %194 = dma.done.wait [#allocation5], 128  }
  0x23   :  { %195 = vsyncadd [#allocation5], 4294967168 }
  0x24   :  { %196 = dma.done.wait [#allocation8], 128  }
  0x25   :  { %197 = vsyncadd [#allocation8], 4294967168  ;;  %v78_v0 = vstv %s270_s0  ;;  %v74_v1 = vld [vmem:[#allocation4] sm:$0xff]  ;;  %v75_v2 = vld [vmem:[#allocation7] sm:$0xff]  ;;  %s202_s0 = smov [#allocation9]  }
  0x26   :  { %v76_v3 = vld [vmem:[%s273_s3] sm:$0xff]  ;;  %v77_v4 = vsub.f32 %v74_v1, %v75_v2  ;;  %s107_s2 = sshll.u32 %s202_s0, 4  ;;  %s108_s2 = int_to_ptr.vmem [resolvable:$true] %s107_s2 }
  0x27   :  { %v79_v5 = vmul.f32 %v78_v0, %v76_v3  ;;  %s172_s3 = scalar_lea.vmem %s108_s2, 128  ;;  %p177_p3 = scmp.lt.s32.totalorder %s108_s2, %s108_s2 }
  0x28   :  { %p173_p2 = scmp.ne.s32.totalorder %s108_s2, %s172_s3  ;;  %p178_p4 = scmp.lt.s32.totalorder %s172_s3, %s172_s3 }
  0x29   :  { %v80_v6 = vadd.f32 1.0, %v79_v5 }
  0x2a   :  { %p179_p5 = por %p178_p4, %p177_p3 }
  0x2b   :  { %v81_v7 = vmul.f32 %v80_v6, %v77_v4 }
  0x2c   :  { %p180_p6 = pnand %p179_p5, %p173_p2 }
  0x2d   :  { %v82_v8 = vand.u32 2147483647, %v81_v7 }
  0x2f   :  { %90 = vadd.xlane.f32.xlu0 %v82_v8 }
  0xbc   :  { %v91_v9 = vpop.xlane.xlu0 %90 }
  0xbd   :  { %v92_v10 = vrot.slane %v91_v9, 4 }
  0xbf   :  { %v93_v11 = vadd.f32 %v92_v10, %v91_v9 }
  0xc1   :  { %v94_v12 = vrot.slane %v93_v11, 2 }
  0xc3   :  { %v95_v13 = vadd.f32 %v94_v12, %v93_v11 }
  0xc5   :  { %v96_v14 = vrot.slane %v95_v13, 1 }
  0xc7   :  { %v97_v15 = vadd.f32 %v96_v14, %v95_v13 }
  0xc9   :  { %123 = vpush %v97_v15 }
  0xfa   :  { %s124_s16 = spop %123 }
  0xfb   :  { %v99_v16 = vstv %s124_s16 }
  0xfc   :  { %100 = vst [vmem:[#allocation9] sm:$0xff] %v99_v16 }
  0xfd   :  { %183 = shalt.err (!%p180_p6)
}
  0xfe   :  { %s184_s19 = scalar_lea.hbm %s274_s4, 128 }
  0xff   :  { %p185_p7 = scmp.ne.s32.totalorder %s274_s4, %s184_s19  ;;  %p188_p8 = scmp.lt.u32.totalorder %s184_s19, %s274_s4 }
 0x101   :  { %p190_p9 = pnand %p188_p8, %p185_p7 }
 0x103   :  { %193 = shalt.err (!%p190_p9)
}
 0x104   :  { %110 = dma.vmem_to_hbm [thread:$0]  %s108_s2, 128, %s274_s4, [#allocation6]  }
 0x105   :  { %198 = dma.done.wait [#allocation6], 128  }
 0x106   :  { %199 = vsyncadd [#allocation6], 4294967168 }
 0x107   :  { %114 = vsyncpa [#allocation5], 1 }
 0x108   :  { %115 = vsyncpa [#allocation8], 1 }
 0x109   :  { %116 = vsyncpa [#allocation6], 1 }

</bundles_post_ra>
